<compile_context>
chip_gen: v6e
topology: v6e:2x2x1
jax: 0.10.0
libtpu: 0.0.40
codegen_flags: <defaults>
</compile_context>

<pallas_src>
import functools
import math

import jax
import jax.numpy as jnp
from jax.experimental import pallas as pl
from jax.experimental.pallas import tpu as pltpu


def _round_up(x, m):
    return ((x + m - 1) // m) * m


def _tpu_vmem_capacity_bytes():
    """Best-effort per-TensorCore VMEM capacity; conservative (v7x) fallback."""
    try:
        info = pltpu.get_tpu_info()
        for name in ("vmem_capacity_bytes", "vmem_size_bytes"):
            cap = getattr(info, name, None)
            if cap:
                return int(cap)
    except Exception:
        pass
    return 64 * 2**20  # v7x-safe fallback


def _step_vmem_bytes(tb, C, S, D, matmul_itemsize, out_itemsize):
    """Per-grid-step VMEM estimate with (8,128) tile padding.

    Feature / output / mask blocks are double-buffered by the pipeline; the
    weight/bias blocks have a constant block index (resident) but are still
    charged twice to stay conservative about Pallas' buffer allocation.
    """
    s_lane = _round_up(S, 128)
    feat = tb * _round_up(C, 8) * s_lane * 4                      # f32 input block
    out = tb * _round_up(S, 8) * _round_up(D, 128) * out_itemsize
    mask = tb * 8 * s_lane * 4
    weight = _round_up(C, 8) * _round_up(D, 128) * matmul_itemsize
    bias = 8 * _round_up(D, 128) * 4
    return 2 * (feat + out + mask) + 2 * (weight + bias)


def _res_embed_kernel(feat_ref, w_ref, b_ref, out_ref, mask_ref):
    """One batch tile of native-NCHW backbone features per grid step.

    feat_ref : (tb, C, S) float32  -- backbone features, NCHW layout (S = H*W)
    w_ref    : (C, D)     matmul dtype -- proj weight transposed (W^T), resident
    b_ref    : (1, D)     float32  -- proj bias, resident
    out_ref  : (tb, S, D) out dtype -- gelu(x @ W^T + b)  (dropout = eval identity)
    mask_ref : (tb, 1, S) float32  -- -100000.0 where channel-sum == 0 else 0.0
    """
    tb = feat_ref.shape[0]
    w = w_ref[...]                 # hoisted: resident weight / bias loads
    b = b_ref[...]
    inv_sqrt2 = jnp.float32(0.7071067811865476)

    for bi in range(tb):           # static unroll; tb is a small compile-time const
        x = feat_ref[bi]                                   # (C, S) float32

        # --- padding mask: f32 channel sum == 0 (exact torch semantics; XLU) ---
        col_sum = jnp.sum(x, axis=0, keepdims=True)        # (1, S)
        mask_ref[bi] = jnp.where(col_sum == 0.0,
                                 jnp.float32(-100000.0), jnp.float32(0.0))

        # --- projection: contract the leading C axis (MXU-native transposed LHS),
        #     bf16 inputs (in-kernel cast) with f32 accumulation by default ---
        y = jax.lax.dot_general(
            x.astype(w.dtype), w,
            dimension_numbers=(((0,), (0,)), ((), ())),
            preferred_element_type=jnp.float32)            # (S, D)
        y = y + b                                          # bcast (1, D)

        # exact (erf) GELU, as nn.GELU(); dropout is identity in eval mode
        g = 0.5 * y * (1.0 + jax.lax.erf(y * inv_sqrt2))
        out_ref[bi] = g.astype(out_ref.dtype)


@functools.partial(jax.jit,
                   static_argnames=("batch_tile", "matmul_dtype", "out_dtype"))
def resnet_embedding_head(features_nchw, w_t, bias, *, batch_tile=8,
                          matmul_dtype=jnp.bfloat16, out_dtype=jnp.float32):
    """features_nchw: (B, C, H, W) backbone output (PyTorch NCHW convention).

    Returns:
      out:          (B, S, d_model)  out_dtype (default float32, as in torch)
      padding_mask: (B, 1, 1, S)     float32
    """
    B, C, H, W = features_nchw.shape
    S = H * W
    D = w_t.shape[1]

    # Glue that stays outside the kernel is free: merging the trailing H,W dims of
    # a contiguous NCHW array is a metadata-only reshape (no transpose, no cast,
    # no extra HBM round trip -- the kernel consumes the NCHW layout directly).
    feats = features_nchw.reshape(B, C, S).astype(jnp.float32)
    w = w_t.astype(matmul_dtype)
    bias2d = bias.reshape(1, D).astype(jnp.float32)

    matmul_itemsize = jnp.dtype(matmul_dtype).itemsize
    out_itemsize = jnp.dtype(out_dtype).itemsize

    # Generation-aware VMEM ceiling: 96 MiB on v5e/v6e (128 MiB physical),
    # ~54 MiB on v7x (64 MiB physical / fallback).
    vmem_cap = _tpu_vmem_capacity_bytes()
    vmem_ceiling = max(16 * 2**20, min(96 * 2**20, int(vmem_cap * 0.85)))

    # Batch tile: keep >= 2 grid tiles whenever B >= 2 (both v7x TensorCores get
    # work), then shrink until the per-step working set fits the VMEM budget.
    tb = max(1, min(int(batch_tile), -(-B // 2))) if B >= 2 else 1
    while tb > 1 and _step_vmem_bytes(tb, C, S, D, matmul_itemsize,
                                      out_itemsize) > vmem_ceiling:
        tb = max(1, tb // 2)

    n_tiles = -(-B // tb)
    b_pad = n_tiles * tb
    if b_pad != B:
        feats = jnp.pad(feats, ((0, b_pad - B), (0, 0), (0, 0)))

    step_bytes = _step_vmem_bytes(tb, C, S, D, matmul_itemsize, out_itemsize)
    vmem_limit = int(min(max(step_bytes + 4 * 2**20, 16 * 2**20), vmem_ceiling))

    cost = pl.CostEstimate(
        flops=2 * b_pad * S * C * D + 6 * b_pad * S * D,
        transcendentals=b_pad * S * D,
        bytes_accessed=(b_pad * C * S * 4 + C * D * matmul_itemsize + D * 4
                        + b_pad * S * D * out_itemsize + b_pad * S * 4),
    )

    out_pad, mask_pad = pl.pallas_call(
        _res_embed_kernel,
        out_shape=(
            jax.ShapeDtypeStruct((b_pad, S, D), out_dtype),
            jax.ShapeDtypeStruct((b_pad, 1, S), jnp.float32),
        ),
        grid_spec=pltpu.PrefetchScalarGridSpec(
            num_scalar_prefetch=0,
            grid=(n_tiles,),
            in_specs=[
                pl.BlockSpec((tb, C, S), lambda i: (i, 0, 0)),   # NCHW feature tile
                pl.BlockSpec((C, D), lambda i: (0, 0)),          # W^T (resident)
                pl.BlockSpec((1, D), lambda i: (0, 0)),          # bias (resident)
            ],
            out_specs=[
                pl.BlockSpec((tb, S, D), lambda i: (i, 0, 0)),   # lane-dense output
                pl.BlockSpec((tb, 1, S), lambda i: (i, 0, 0)),   # padding mask
            ],
        ),
        compiler_params=pltpu.CompilerParams(
            dimension_semantics=("parallel",),
            vmem_limit_bytes=vmem_limit,
        ),
        cost_estimate=cost,
    )(feats, w, bias2d)

    out = out_pad[:B]
    padding_mask = mask_pad[:B].reshape(B, 1, 1, S)
    return out, padding_mask


def _reference(features_nchw, w_t, bias, matmul_dtype=jnp.float32):
    """Pure-JAX reference (mask on f32 features, same precision policy on request)."""
    B, C, H, W = features_nchw.shape
    feats = jnp.transpose(features_nchw.reshape(B, C, H * W), (0, 2, 1))  # (B,S,C)
    mask = (jnp.sum(feats, axis=-1) == 0.0).astype(jnp.float32) * -100000.0
    mask = mask[:, None, None, :]
    y = jnp.dot(feats.astype(matmul_dtype), w_t.astype(matmul_dtype),
                preferred_element_type=jnp.float32,
                precision=jax.lax.Precision.HIGHEST) + bias
    out = 0.5 * y * (1.0 + jax.lax.erf(y * jnp.float32(0.7071067811865476)))
    return out, mask


if __name__ == "__main__":
    # Small shapes consistent with the module:
    #   backbone output (B, d_features, H, W); proj: d_features -> d_model.
    B, C, H, W = 2, 256, 7, 7          # d_features = 256, S = 49 (ResNet-like 7x7)
    D = 128                            # d_model
    S = H * W

    key = jax.random.PRNGKey(0)
    k_feat, k_w, k_b = jax.random.split(key, 3)

    features = jax.random.normal(k_feat, (B, C, H, W), dtype=jnp.float32)
    # Zero one spatial position of one batch element to exercise the mask path.
    features = features.at[1, :, 0, 0].set(0.0)

    # Deterministic nn.Linear-style init: U(-1/sqrt(C), 1/sqrt(C)).
    bound = 1.0 / math.sqrt(C)
    w = jax.random.uniform(k_w, (D, C), jnp.float32, -bound, bound)   # torch (out, in)
    b = jax.random.uniform(k_b, (D,), jnp.float32, -bound, bound)
    w_t = w.T                                                         # (C, D)

    ref_bf16, ref_mask = _reference(features, w_t, b, matmul_dtype=jnp.bfloat16)
    ref_f32, _ = _reference(features, w_t, b, matmul_dtype=jnp.float32)

    # Default path: bf16 MXU inputs (in-kernel cast), f32 accumulation, f32 output;
    # B=2 -> tb=1 -> 2 grid tiles (megacore-shardable).
    out, padding_mask = resnet_embedding_head(features, w_t, b)
    jax.block_until_ready((out, padding_mask))
    assert out.shape == (B, S, D) and out.dtype == jnp.float32
    assert padding_mask.shape == (B, 1, 1, S)
    assert jnp.allclose(out, ref_bf16, atol=1e-3, rtol=1e-3)
    assert jnp.allclose(out, ref_f32, atol=5e-2, rtol=5e-2)     # bf16-vs-f32 sanity
    assert jnp.array_equal(padding_mask, ref_mask)               # exact f32 mask

    # Exact torch-f32 semantics path.
    out32, mask32 = resnet_embedding_head(features, w_t, b,
                                          matmul_dtype=jnp.float32)
    jax.block_until_ready((out32, mask32))
    assert jnp.allclose(out32, ref_f32, atol=1e-2, rtol=1e-2)
    assert jnp.array_equal(mask32, ref_mask)

    # Ragged batch: exercises batch padding + multi-element tiles (tb=2, 3 tiles).
    B2 = 5
    features2 = jax.random.normal(jax.random.PRNGKey(1), (B2, C, H, W), jnp.float32)
    features2 = features2.at[0, :, 2, 3].set(0.0)
    ref2, refm2 = _reference(features2, w_t, b, matmul_dtype=jnp.bfloat16)
    out2, mask2 = resnet_embedding_head(features2, w_t, b, batch_tile=2)
    jax.block_until_ready((out2, mask2))
    assert out2.shape == (B2, S, D) and mask2.shape == (B2, 1, 1, S)
    assert jnp.allclose(out2, ref2, atol=1e-3, rtol=1e-3)
    assert jnp.array_equal(mask2, refm2)

    print("KERNEL_OK")
</pallas_src>

<mosaic_0001>
module attributes {stable_mosaic.version = 11 : i64} {
  func.func @_res_embed_kernel(%arg0: i32, %arg1: memref<1x256x49xf32, #tpu.memory_space<vmem>>, %arg2: memref<256x128xbf16, #tpu.memory_space<vmem>>, %arg3: memref<1x128xf32, #tpu.memory_space<vmem>>, %arg4: memref<1x49x128xf32, #tpu.memory_space<vmem>>, %arg5: memref<1x1x49xf32, #tpu.memory_space<vmem>>) attributes {dimension_semantics = [#tpu.dimension_semantics<parallel>], iteration_bounds = array<i64: 2>, scalar_prefetch = 0 : i64, scratch_operands = 0 : i64, tpu.core_type = #tpu.core_type<tc>, window_params = [{transform_indices = @transform_0, window_bounds = array<i64: 1, 256, 49>}, {pipeline_mode = #tpu.pipeline_mode<synchronous>, transform_indices = @transform_1, window_bounds = array<i64: 256, 128>}, {pipeline_mode = #tpu.pipeline_mode<synchronous>, transform_indices = @transform_2, window_bounds = array<i64: 1, 128>}, {transform_indices = @transform_3, window_bounds = array<i64: 1, 49, 128>}, {transform_indices = @transform_4, window_bounds = array<i64: 1, 1, 49>}]} {
    %c0 = arith.constant 0 : index
    %c0_0 = arith.constant 0 : index
    %0 = vector.load %arg2[%c0, %c0_0] : memref<256x128xbf16, #tpu.memory_space<vmem>>, vector<256x128xbf16>
    %c0_1 = arith.constant 0 : index
    %c0_2 = arith.constant 0 : index
    %1 = vector.load %arg3[%c0_1, %c0_2] : memref<1x128xf32, #tpu.memory_space<vmem>>, vector<1x128xf32>
    %c0_3 = arith.constant 0 : index
    %c0_4 = arith.constant 0 : index
    %c0_5 = arith.constant 0 : index
    %2 = vector.load %arg1[%c0_3, %c0_4, %c0_5] : memref<1x256x49xf32, #tpu.memory_space<vmem>>, vector<1x256x49xf32>
    %3 = vector.shape_cast %2 : vector<1x256x49xf32> to vector<256x49xf32>
    %cst = arith.constant dense<0.000000e+00> : vector<49xf32>
    %4 = vector.multi_reduction <add>, %3, %cst [0] : vector<256x49xf32> to vector<49xf32>
    %5 = vector.shape_cast %4 : vector<49xf32> to vector<1x49xf32>
    %cst_6 = arith.constant 0.000000e+00 : f32
    %6 = vector.broadcast %cst_6 : f32 to vector<1x49xf32>
    %7 = arith.cmpf oeq, %5, %6 : vector<1x49xf32>
    %cst_7 = arith.constant -1.000000e+05 : f32
    %cst_8 = arith.constant 0.000000e+00 : f32
    %8 = vector.broadcast %cst_7 : f32 to vector<1x49xf32>
    %9 = vector.broadcast %cst_8 : f32 to vector<1x49xf32>
    %10 = arith.select %7, %8, %9 : vector<1x49xi1>, vector<1x49xf32>
    %c0_9 = arith.constant 0 : index
    %c0_10 = arith.constant 0 : index
    %c0_11 = arith.constant 0 : index
    %11 = vector.load %arg5[%c0_9, %c0_10, %c0_11] : memref<1x1x49xf32, #tpu.memory_space<vmem>>, vector<1x1x49xf32>
    %12 = vector.shape_cast %11 : vector<1x1x49xf32> to vector<1x49xf32>
    %13 = vector.shape_cast %10 : vector<1x49xf32> to vector<1x1x49xf32>
    tpu.vector_store %arg5[%c0_9, %c0_10, %c0_11], %13 {strides = array<i32>} : memref<1x1x49xf32, #tpu.memory_space<vmem>>, vector<1x1x49xf32>,
    %14 = arith.truncf %3 : vector<256x49xf32> to vector<256x49xbf16>
    %cst_12 = arith.constant dense<0.000000e+00> : vector<49x128xf32>
    %15 = tpu.matmul %14, %0, %cst_12 {dimension_numbers = #tpu.dot_dimension_numbers<[0], [0], [1], [1], [0, 1, 1, 1], [], []>} : vector<256x49xbf16>, vector<256x128xbf16>, vector<49x128xf32> -> vector<49x128xf32>
    %16 = vector.broadcast %1 : vector<1x128xf32> to vector<49x128xf32>
    %17 = arith.addf %15, %16 : vector<49x128xf32>
    %cst_13 = arith.constant 5.000000e-01 : f32
    %18 = vector.broadcast %cst_13 : f32 to vector<49x128xf32>
    %19 = arith.mulf %18, %17 : vector<49x128xf32>
    %cst_14 = arith.constant 0.707106769 : f32
    %20 = vector.broadcast %cst_14 : f32 to vector<49x128xf32>
    %21 = arith.mulf %17, %20 : vector<49x128xf32>
    %22 = math.erf %21 : vector<49x128xf32>
    %cst_15 = arith.constant 1.000000e+00 : f32
    %23 = vector.broadcast %cst_15 : f32 to vector<49x128xf32>
    %24 = arith.addf %23, %22 : vector<49x128xf32>
    %25 = arith.mulf %19, %24 : vector<49x128xf32>
    %c0_16 = arith.constant 0 : index
    %c0_17 = arith.constant 0 : index
    %c0_18 = arith.constant 0 : index
    %26 = vector.load %arg4[%c0_16, %c0_17, %c0_18] : memref<1x49x128xf32, #tpu.memory_space<vmem>>, vector<1x49x128xf32>
    %27 = vector.shape_cast %26 : vector<1x49x128xf32> to vector<49x128xf32>
    %28 = vector.shape_cast %25 : vector<49x128xf32> to vector<1x49x128xf32>
    tpu.vector_store %arg4[%c0_16, %c0_17, %c0_18], %28 {strides = array<i32>} : memref<1x49x128xf32, #tpu.memory_space<vmem>>, vector<1x49x128xf32>,
    return
  }
  func.func @transform_0(%arg0: i32) -> (i32, i32, i32) {
    %c0_i32 = arith.constant 0 : i32
    %c0_i32_0 = arith.constant 0 : i32
    %c0_i32_1 = arith.constant 0 : i32
    return %arg0, %c0_i32, %c0_i32_0 : i32, i32, i32
  }
  func.func @transform_1(%arg0: i32) -> (i32, i32) {
    %c0_i32 = arith.constant 0 : i32
    %c0_i32_0 = arith.constant 0 : i32
    %c0_i32_1 = arith.constant 0 : i32
    return %c0_i32, %c0_i32_0 : i32, i32
  }
  func.func @transform_2(%arg0: i32) -> (i32, i32) {
    %c0_i32 = arith.constant 0 : i32
    %c0_i32_0 = arith.constant 0 : i32
    %c0_i32_1 = arith.constant 0 : i32
    return %c0_i32, %c0_i32_0 : i32, i32
  }
  func.func @transform_3(%arg0: i32) -> (i32, i32, i32) {
    %c0_i32 = arith.constant 0 : i32
    %c0_i32_0 = arith.constant 0 : i32
    %c0_i32_1 = arith.constant 0 : i32
    return %arg0, %c0_i32, %c0_i32_0 : i32, i32, i32
  }
  func.func @transform_4(%arg0: i32) -> (i32, i32, i32) {
    %c0_i32 = arith.constant 0 : i32
    %c0_i32_0 = arith.constant 0 : i32
    %c0_i32_1 = arith.constant 0 : i32
    return %arg0, %c0_i32, %c0_i32_0 : i32, i32, i32
  }
}

</mosaic_0001>

<bundles_post_ra>
// kernel: resnet_embedding_head.1
= control target key start
LH: loop header
LB: loop body
LE: loop exit
PB: predicated region body
PF: predicated region fallthrough
CT: control target
= control target key end

     0   :  { %10 = vsyncpa [#allocation3], 0  ;;  %s1233_s0 = inlined_call_operand.vmem [shape: f32[2,256,49], index: 0, kind: input, shape index: {}]   ;;  %s1234_s1 = inlined_call_operand.vmem [shape: bf16[256,128], index: 1, kind: input, shape index: {}]   ;;  %s1235_s2 = inlined_call_operand.vmem [shape: f32[1,128], index: 2, kind: input, shape index: {}]   ;;  %s1236_s3 = inlined_call_operand.vmem [shape: f32[2,49,128], index: 3, kind: output, shape index: {0}]   ;;  %s1237_s4 = inlined_call_operand.hbm [shape: f32[2,1,49], index: 4, kind: output, shape index: {1}]  }
   0x1   :  { %12 = vsyncpa [#allocation3 + $0x1], 0  ;;  %s949_s15 = smov 0   ;;  %s951_s16 = smov 0  }
   0x2   :  { %s953_s17 = smov 0   ;;  %s955_s18 = smov 0  }
   0x3 LB: > { %s970_s19 = sadd.s32 4294967295, %s920_s18   ;;  %s705_s20 = sadd.s32 4294967294, %s920_s18   ;;  %s920_s18 = sphi %s955_s18, %s1243_s18   ;;  %s916_s17 = sphi %s953_s17, %s1242_s17   ;;  %s912_s16 = sphi %s951_s16, %s1241_s16   ;;  %s908_s15 = sphi %s949_s15, %s1240_s15  }
   0x4   : > { %s974_s21 = sadd.s32 1, %s920_s18   ;;  %s119_s22 = sadd.s32 1, %s916_s17 }
   0x5   : > { %s116_s23 = ssub.s32 %s920_s18, %s974_s21  ;;  %p129_p0 = scmp.ne.s32.totalorder %s916_s17, %s912_s16 }
   0x6   : > { %p117_p1 = scmp.eq.s32.totalorder %s116_s23, 0  ;;  %p130_p2 = scmp.eq.s32.totalorder %s970_s19, 1 }
   0x7   : > { %p135_p3 = scmp.ne.s32.totalorder %s912_s16, %s908_s15  ;;  %p136_p4 = scmp.eq.s32.totalorder %s705_s20, 1 }
   0x8   : > { %s985_s24 = scalar_select %p117_p1, %s916_s17, %s119_s22  }
   0x9   : > { %p987_p5 = por %p130_p2, %p129_p0  ;;  %p991_p6 = por %p136_p4, %p135_p3 }
   0xa   : > { %p708_p7 = scmp.ge.s32.totalorder %s920_s18, 1  ;;  %p168_p8 = scmp.lt.s32.totalorder %s920_s18, 3 }
   0xc   : > { %p169_p9 = pnand %p708_p7, %p168_p8 }
   0xd   : > { %p198_p10 = scmp.lt.s32.totalorder (!%p169_p9), %s970_s19, 1  ;;  %s196_s6 = sand.u32 (!%p169_p9), 1, %s912_s16  }
   0xe   : > { %172 = sbr.rel (%p169_p9) target bundleno = 362 (0x16a), region = 32  ;;  %s729_s7 = sshll.u32 (!%p169_p9), %s970_s19, 4 }
   0xf   : > { %s623_s11 = scalar_lea.hbm (!%p169_p9), %s1237_s4, %s729_s7  ;;  %s610_s14 = scalar_lea.sflag (!%p169_p9), [#allocation3], %s196_s6 }
  0x10   : > { %s923_s22 = smov (!%p169_p9), [#allocation2]  }
  0x11   : > { %s864_s23 = sshll.u32 (!%p169_p9), %s923_s22, 4  ;;  %s865_s23 = int_to_ptr.vmem [resolvable:$false] %s864_s23 }
  0x12   : > { %s866_s27 = scalar_lea.vmem (!%p169_p9), %s865_s23, 32 }
  0x13   : > { %v830_v0 = vld [vmem:[%s1234_s1 + $0x78] sm:$0xff]   ;;  %s1002_s29 = scalar_select %p198_p10, %s970_s19, 1  ;;  %vm274_vm0 = vcmask 400384   ;;  %v832_v2 = vld [vmem:[%s1234_s1 + $0x70] sm:$0xff]   ;;  %v834_v4 = vld [vmem:[%s1234_s1 + $0x68] sm:$0xff]   ;;  %vm346_vm2 = vcmask 393216  }
  0x14   : > { %v831_v1 = vld [vmem:[%s1234_s1 + $0x38] sm:$0xff]   ;;  %733 = vmatprep.subr.bf16.mxu0 %v830_v0  ;;  %773 = vmatprep.subr.bf16.mxu1 %v830_v0  ;;  %v833_v3 = vld [vmem:[%s1234_s1 + $0x30] sm:$0xff]   ;;  %v835_v42 = vld [vmem:[%s1234_s1 + $0x28] sm:$0xff]  }
  0x15   : > { %s732_s8 = sshll.u32 %s1002_s29, 8  ;;  %734 = vmatpush3.bf16.msra.mxu0 %v831_v1  ;;  %781 = vmatpush3.bf16.msra.mxu1 %v831_v1  ;;  %v836_v48 = vld [vmem:[%s1234_s1 + $0x60] sm:$0xff]   ;;  %v838_v53 = vld [vmem:[%s1234_s1 + $0x58] sm:$0xff]   ;;  %v840_v1 = vld [vmem:[%s1234_s1 + $0x50] sm:$0xff]  }
  0x16   : > { %s1017_s13 = scalar_lea.vmem %s1233_s0, %s732_s8  ;;  %735 = vmatprep.subr.bf16.mxu0 %v832_v2  ;;  %774 = vmatprep.subr.bf16.mxu1 %v832_v2  ;;  %v837_v49 = vld [vmem:[%s1234_s1 + $0x20] sm:$0xff]   ;;  %v839_v60 = vld [vmem:[%s1234_s1 + $0x18] sm:$0xff]   ;;  %s197_s8 = scalar_lea.vmem [#allocation2], %s196_s6 }
  0x17   : > { %v1023_v5 = vld [vmem:[%s1017_s13 + $0x80] sm:$0xff]  ;;  %v1026_v6 = vld [vmem:[%s1017_s13 + $0x88] sm:$0xff]  ;;  %v1034_v11 = vld [vmem:[%s1017_s13 + $0x90] sm:$0xff]  ;;  %s625_s12 = sshll.u32 %s197_s8, 4  ;;  %s626_s12 = int_to_ptr.vmem [resolvable:$true] %s625_s12 }
  0x18   : > { %v242_v7 = vld [vmem:[%s1017_s13] sm:$0xff]  ;;  %v356_v8 = vpack.c.bf16 %v1026_v6, %v1023_v5  ;;  %v243_v9 = vld [vmem:[%s1017_s13 + $0x8] sm:$0xff]  ;;  %v1037_v12 = vld [vmem:[%s1017_s13 + $0x98] sm:$0xff]  ;;  %s860_s20 = scalar_lea.vmem %s626_s12, 16  ;;  %p867_p0 = scmp.lt.s32.totalorder %s626_s12, %s865_s23 }
  0x19   : > { %v275_v10 = vsel %vm274_vm0, %v242_v7, 0.0  ;;  %v276_v13 = vsel %vm274_vm0, %v243_v9, 0.0  ;;  %v348_v14 = vpack.c.bf16 %v243_v9, %v242_v7  ;;  %v244_v15 = vld [vmem:[%s1017_s13 + $0x10] sm:$0xff]  ;;  %v245_v16 = vld [vmem:[%s1017_s13 + $0x18] sm:$0xff]  ;;  %736 = vmatpush3.bf16.msra.mxu0 %v833_v3  ;;  %782 = vmatpush3.bf16.msra.mxu1 %v833_v3  ;;  %v357_v18 = vpack.c.bf16 %v1037_v12, %v1034_v11  ;;  %v1047_v22 = vld [vmem:[%s1017_s13 + $0xa0] sm:$0xff]  ;;  %p861_p11 = scmp.ne.s32.totalorder %s626_s12, %s860_s20  ;;  %p868_p1 = scmp.lt.s32.totalorder %s866_s27, %s860_s20 }
  0x1a   : > { %386 = vxpose.xlu0.c.b16.start [1/8] (narrow) %v356_v8, 64  ;;  %v277_v17 = vadd.f32 %v276_v13, %v275_v10  ;;  %v278_v19 = vsel %vm274_vm0, %v244_v15, 0.0  ;;  %737 = vmatprep.subr.bf16.mxu0 %v834_v4  ;;  %v280_v20 = vsel %vm274_vm0, %v245_v16, 0.0  ;;  %v349_v21 = vpack.c.bf16 %v245_v16, %v244_v15  ;;  %v1050_v23 = vld [vmem:[%s1017_s13 + $0xa8] sm:$0xff]  ;;  %v246_v25 = vld [vmem:[%s1017_s13 + $0x20] sm:$0xff]  ;;  %v1059_v32 = vld [vmem:[%s1017_s13 + $0xb0] sm:$0xff] }
  0x1b   : > { %370 = vxpose.xlu1.c.b16.start [1/8] (narrow) %v348_v14, 64  ;;  %775 = vmatprep.subr.bf16.mxu1 %v834_v4  ;;  %v247_v26 = vld [vmem:[%s1017_s13 + $0x28] sm:$0xff]  ;;  %v282_v27 = vsel %vm274_vm0, %v246_v25, 0.0  ;;  %v358_v29 = vpack.c.bf16 %v1050_v23, %v1047_v22  ;;  %v1062_v33 = vld [vmem:[%s1017_s13 + $0xb8] sm:$0xff]  ;;  %v248_v35 = vld [vmem:[%s1017_s13 + $0x30] sm:$0xff]  ;;  %p862_p12 = pnand %p861_p11, %p987_p5  ;;  %p869_p2 = por %p868_p1, %p867_p0 }
  0x1c   : > { %v279_v24 = vadd.f32 %v278_v19, %v277_v17  ;;  %v284_v30 = vsel %vm274_vm0, %v247_v26, 0.0  ;;  %v350_v31 = vpack.c.bf16 %v247_v26, %v246_v25  ;;  %v249_v36 = vld [vmem:[%s1017_s13 + $0x38] sm:$0xff]  ;;  %v286_v37 = vsel %vm274_vm0, %v248_v35, 0.0  ;;  %v1068_v38 = vld [vmem:[%s1017_s13 + $0xc0] sm:$0xff]  ;;  %v1073_v41 = vld [vmem:[%s1017_s13 + $0xc8] sm:$0xff] }
  0x1d   : > { %v359_v40 = vpack.c.bf16 %v1062_v33, %v1059_v32  ;;  %v288_v43 = vsel %vm274_vm0, %v249_v36, 0.0  ;;  %v351_v44 = vpack.c.bf16 %v249_v36, %v248_v35  ;;  %v250_v45 = vld [vmem:[%s1017_s13 + $0x40] sm:$0xff]  ;;  %v251_v46 = vld [vmem:[%s1017_s13 + $0x48] sm:$0xff]  ;;  %738 = vmatpush3.bf16.msra.mxu0 %v835_v42  ;;  %783 = vmatpush3.bf16.msra.mxu1 %v835_v42  ;;  %v1089_v51 = vld [vmem:[%s1017_s13 + $0xd0] sm:$0xff]  ;;  %v360_v55 = vpack.c.bf16 %v1073_v41, %v1068_v38  ;;  %p863_p13 = pneg %p862_p12 }
  0x1e   : > { %387 = vxpose.xlu0.c.b16.cont [2/8] (narrow) %v357_v18, 64  ;;  %v281_v28 = vadd.f32 %v280_v20, %v279_v24  ;;  %v290_v50 = vsel %vm274_vm0, %v250_v45, 0.0  ;;  %v1092_v52 = vld [vmem:[%s1017_s13 + $0xd8] sm:$0xff]  ;;  %v292_v56 = vsel %vm274_vm0, %v251_v46, 0.0  ;;  %v252_v57 = vld [vmem:[%s1017_s13 + $0x50] sm:$0xff]  ;;  %739 = vmatprep.subr.bf16.mxu0 %v836_v48  ;;  %v352_v59 = vpack.c.bf16 %v251_v46, %v250_v45  ;;  %v1107_v63 = vld [vmem:[%s1017_s13 + $0xe0] sm:$0xff] }
  0x1f   : > { %371 = vxpose.xlu1.c.b16.cont [2/8] (narrow) %v349_v21, 64  ;;  %v253_v58 = vld [vmem:[%s1017_s13 + $0x58] sm:$0xff]  ;;  %776 = vmatprep.subr.bf16.mxu1 %v836_v48  ;;  %v294_v62 = vsel %vm274_vm0, %v252_v57, 0.0  ;;  %v1110_v0 = vld [vmem:[%s1017_s13 + $0xe8] sm:$0xff]  ;;  %v361_v3 = vpack.c.bf16 %v1092_v52, %v1089_v51  ;;  %v254_v4 = vld [vmem:[%s1017_s13 + $0x60] sm:$0xff]  ;;  %v308_v42 = vsel %vm274_vm0, %v1026_v6, 0.0  ;;  %p870_p3 = pnand %p869_p2, %p863_p13 }
  0x20   : > { %v283_v34 = vadd.f32 %v282_v27, %v281_v28  ;;  %v255_v7 = vld [vmem:[%s1017_s13 + $0x68] sm:$0xff]  ;;  %v296_v8 = vsel %vm274_vm0, %v253_v58, 0.0  ;;  %v353_v9 = vpack.c.bf16 %v253_v58, %v252_v57  ;;  %v841_v13 = vld [vmem:[%s1234_s1 + $0x10] sm:$0xff]   ;;  %v298_v14 = vsel %vm274_vm0, %v254_v4, 0.0  ;;  %v1134_v21 = vld [vmem:[%s1017_s13 + $0xf8] sm:$0xff] }
  0x21   : > { %740 = vmatpush3.bf16.msra.mxu0 %v837_v49  ;;  %784 = vmatpush3.bf16.msra.mxu1 %v837_v49  ;;  %v842_v15 = vld [vmem:[%s1234_s1 + $0x48] sm:$0xff]   ;;  %v362_v17 = vpack.c.bf16 %v1110_v0, %v1107_v63  ;;  %v300_v18 = vsel %vm274_vm0, %v255_v7, 0.0  ;;  %v354_v19 = vpack.c.bf16 %v255_v7, %v254_v4  ;;  %v1131_v20 = vld [vmem:[%s1017_s13 + $0xf0] sm:$0xff]  ;;  %v257_v26 = vld [vmem:[%s1017_s13 + $0x78] sm:$0xff]  ;;  %v312_v46 = vsel %vm274_vm0, %v1037_v12, 0.0 }
  0x22   : > { %388 = vxpose.xlu0.c.b16.cont [3/8] (narrow) %v358_v29, 64  ;;  %v285_v39 = vadd.f32 %v284_v30, %v283_v34  ;;  %741 = vmatprep.subr.bf16.mxu0 %v838_v53  ;;  %v256_v25 = vld [vmem:[%s1017_s13 + $0x70] sm:$0xff]  ;;  %v843_v27 = vld [vmem:[%s1234_s1 + $0x8] sm:$0xff]   ;;  %v844_v29 = vld [vmem:[%s1234_s1 + $0x40] sm:$0xff]   ;;  %v304_v34 = vsel %vm274_vm0, %v257_v26, 0.0  ;;  %v316_v49 = vsel %vm274_vm0, %v1050_v23, 0.0 }
  0x23   : > { %372 = vxpose.xlu1.c.b16.cont [3/8] (narrow) %v350_v31, 64  ;;  %777 = vmatprep.subr.bf16.mxu1 %v838_v53  ;;  %v302_v28 = vsel %vm274_vm0, %v256_v25, 0.0  ;;  %v363_v31 = vpack.c.bf16 %v1134_v21, %v1131_v20  ;;  %v355_v35 = vpack.c.bf16 %v257_v26, %v256_v25  ;;  %v322_v12 = vsel %vm274_vm0, %v1068_v38, 0.0 }
  0x24   : > { %v287_v47 = vadd.f32 %v286_v37, %v285_v39  ;;  %v845_v37 = vld [vmem:[%s1234_s1] sm:$0xff]   ;;  %v306_v39 = vsel %vm274_vm0, %v1023_v5, 0.0  ;;  %v314_v5 = vsel %vm274_vm0, %v1047_v22, 0.0  ;;  %v324_v22 = vsel %vm274_vm0, %v1073_v41, 0.0 }
  0x25   : > { %742 = vmatpush3.bf16.msra.mxu0 %v839_v60  ;;  %785 = vmatpush3.bf16.msra.mxu1 %v839_v60  ;;  %v326_v41 = vsel %vm274_vm0, %v1089_v51, 0.0  ;;  %v332_v4 = vsel %vm274_vm0, %v1110_v0, 0.0  ;;  %v336_v51 = vsel %vm274_vm0, %v1134_v21, 0.0  ;;  %v922_v0 = vmov 0.0  }
  0x26   : > { %389 = vxpose.xlu0.c.b16.cont [4/8] (narrow) %v359_v40, 64  ;;  %v289_v54 = vadd.f32 %v288_v43, %v287_v47  ;;  %743 = vmatprep.subr.bf16.mxu0 %v840_v1 }
  0x27   : > { %373 = vxpose.xlu1.c.b16.cont [4/8] (narrow) %v351_v44, 64  ;;  %778 = vmatprep.subr.bf16.mxu1 %v840_v1  ;;  %v310_v44 = vsel %vm274_vm0, %v1034_v11, 0.0  ;;  %v320_v11 = vsel %vm274_vm0, %v1062_v33, 0.0 }
  0x28   : > { %v291_v61 = vadd.f32 %v290_v50, %v289_v54  ;;  %v318_v50 = vsel %vm274_vm0, %v1059_v32, 0.0 }
  0x29   : > { %744 = vmatpush3.bf16.msra.mxu0 %v841_v13  ;;  %786 = vmatpush3.bf16.msra.mxu1 %v841_v13 }
  0x2a   : > { %390 = vxpose.xlu0.c.b16.cont [5/8] (narrow) %v360_v55, 64  ;;  %v293_v2 = vadd.f32 %v292_v56, %v291_v61  ;;  %745 = vmatprep.subr.bf16.mxu0 %v842_v15 }
  0x2b   : > { %374 = vxpose.xlu1.c.b16.cont [5/8] (narrow) %v352_v59, 64  ;;  %779 = vmatprep.subr.bf16.mxu1 %v842_v15 }
  0x2c   : > { %v295_v10 = vadd.f32 %v294_v62, %v293_v2  ;;  %v328_v62 = vsel %vm274_vm0, %v1092_v52, 0.0  ;;  %v330_v2 = vsel %vm274_vm0, %v1107_v63, 0.0 }
  0x2d   : > { %746 = vmatpush3.bf16.msra.mxu0 %v843_v27  ;;  %787 = vmatpush3.bf16.msra.mxu1 %v843_v27 }
  0x2e   : > { %391 = vxpose.xlu0.c.b16.cont [6/8] (narrow) %v361_v3, 64  ;;  %v297_v16 = vadd.f32 %v296_v8, %v295_v10  ;;  %747 = vmatprep.subr.bf16.mxu0 %v844_v29  ;;  %v334_v8 = vsel %vm274_vm0, %v1131_v20, 0.0 }
  0x2f   : > { %375 = vxpose.xlu1.c.b16.cont [6/8] (narrow) %v353_v9, 64  ;;  %780 = vmatprep.subr.bf16.mxu1 %v844_v29 }
  0x30   : > { %v299_v24 = vadd.f32 %v298_v14, %v297_v16 }
  0x31   : > { %748 = vmatpush3.bf16.msra.mxu0 %v845_v37  ;;  %788 = vmatpush3.bf16.msra.mxu1 %v845_v37 }
  0x32   : > { %392 = vxpose.xlu0.c.b16.cont [7/8] (narrow) %v362_v17, 64  ;;  %v301_v30 = vadd.f32 %v300_v18, %v299_v24 }
  0x33   : > { %376 = vxpose.xlu1.c.b16.cont [7/8] (narrow) %v354_v19, 64 }
  0x34   : > { %v303_v36 = vadd.f32 %v302_v28, %v301_v30 }
  0x36   : > { %393 = vxpose.xlu0.c.b16.end [8/8] (narrow) %v363_v31, 64  ;;  %v305_v40 = vadd.f32 %v304_v34, %v303_v36 }
  0x37   : > { %377 = vxpose.xlu1.c.b16.end [8/8] (narrow) %v355_v35, 64 }
  0x38   : > { %v307_v43 = vadd.f32 %v306_v39, %v305_v40 }
  0x3a   : > { %v309_v45 = vadd.f32 %v308_v42, %v307_v43 }
  0x3c   : > { %v311_v47 = vadd.f32 %v310_v44, %v309_v45 }
  0x3e   : > { %v313_v48 = vadd.f32 %v312_v46, %v311_v47 }
  0x40   : > { %v315_v6 = vadd.f32 %v314_v5, %v313_v48 }
  0x42   : > { %v317_v53 = vadd.f32 %v316_v49, %v315_v6 }
  0x44   : > { %v319_v54 = vadd.f32 %v318_v50, %v317_v53 }
  0x46   : > { %v321_v55 = vadd.f32 %v320_v11, %v319_v54 }
  0x48   : > { %v323_v56 = vadd.f32 %v322_v12, %v321_v55 }
  0x4a   : > { %v325_v57 = vadd.f32 %v324_v22, %v323_v56 }
  0x4c   : > { %v327_v1 = vadd.f32 %v326_v41, %v325_v57 }
  0x4e   : > { %v329_v3 = vadd.f32 %v328_v62, %v327_v1 }
  0x50   : > { %v331_v7 = vadd.f32 %v330_v2, %v329_v3 }
  0x52   : > { %v333_v9 = vadd.f32 %v332_v4, %v331_v7 }
  0x54   : > { %v335_v10 = vadd.f32 %v334_v8, %v333_v9 }
  0x56   : > { %v337_v52 = vadd.f32 %v336_v51, %v335_v10 }
  0x58   : > { %v338_v13 = vrot.slane %v337_v52, 4 }
  0x5a   : > { %v339_v14 = vadd.f32 %v338_v13, %v337_v52 }
  0x5c   : > { %v340_v15 = vrot.slane %v339_v14, 2 }
  0x5e   : > { %v341_v16 = vadd.f32 %v340_v15, %v339_v14 }
  0x60   : > { %v342_v63 = vrot.slane %v341_v16, 1 }
  0x62   : > { %v343_v17 = vadd.f32 %v342_v63, %v341_v16 }
  0x64   : > { %vm344_vm1 = vcmp.eq.f32.partialorder %v343_v17, 0.0 }
  0x65   : > { %v345_v18 = vsel %vm344_vm1, -100000.0, %v922_v0 }
  0x66   : > { %347 = vst.msk [vmem:[%s197_s8] sm:$0x1] %vm346_vm2, %v345_v18 }
  0x7c   : > { %v394_v58 = vpop.trf.xlu0 }
  0x7d   : > { %530 = vmatprep.mubr.bf16.mxu0 %v394_v58  ;;  %v378_v23 = vpop.trf.xlu1 }
  0x7e   : > { %531 = vmatmul.mubr.bf16.vlgmr.msra.gmra.mxu0 %v378_v23 }
  0x80   : > { %v395_v59 = vpop.trf.xlu0 }
  0x81   : > { %538 = vmatprep.mubr.bf16.mxu0 %v395_v59  ;;  %v379_v32 = vpop.trf.xlu1 }
  0x84   : > { %v396_v60 = vpop.trf.xlu0 }
  0x85   : > { %546 = vmatprep.mubr.bf16.mxu1 %v396_v60  ;;  %v380_v33 = vpop.trf.xlu1 }
  0x86   : > { %539 = vmatmul.mubr.bf16.gmra.mxu0 %v379_v32  ;;  %547 = vmatmul.mubr.bf16.vlgmr.msra.gmra.mxu1 %v380_v33 }
  0x88   : > { %v397_v61 = vpop.trf.xlu0 }
  0x89   : > { %554 = vmatprep.mubr.bf16.mxu1 %v397_v61  ;;  %v381_v38 = vpop.trf.xlu1 }
  0x8e   : > { %555 = vmatmul.mubr.bf16.gmra.mxu1 %v381_v38 }
  0x8f   : > { %873 = shalt.err (!%p870_p3)
}
  0x90   : > { %s874_s19 = scalar_lea.hbm %s623_s11, 16  ;;  %s878_s13 = scalar_lea.hbm %s1237_s4, 32 }
  0x91   : > { %p875_p4 = scmp.ne.s32.totalorder %s623_s11, %s874_s19  ;;  %p879_p9 = scmp.lt.s32.totalorder %s623_s11, %s1237_s4 }
  0x92   : > { %p880_p10 = scmp.lt.s32.totalorder %s878_s13, %s874_s19 }
  0x93   : > { %p876_p7 = pnand %p875_p4, %p987_p5 }
  0x94   : > { %p881_p11 = por %p880_p10, %p879_p9 }
  0x95   : > { %p877_p8 = pneg %p876_p7 }
  0x97   : > { %p882_p12 = pnand %p881_p11, %p877_p8 }
  0x99   : > { %885 = shalt.err (!%p882_p12)
}
  0x9a   : > { %790 = dma.vmem_to_hbm [thread:$0]  (%p987_p5), %s626_s12, 16, %s623_s11, %s610_s14   ;;  %v712_v20 = vld [vmem:[%s1235_s2] ss:$0 sm:$0xff] }
  0x9b   : > { %s789_s25 = smul.u32 56, %s1002_s29 }
  0x9d   : > { %s1207_s11 = scalar_lea.vmem %s1236_s3, %s789_s25 }
 0x13e   : > { %v749_v19 = vpop.f32.mrf.mxu0 }
 0x140   : > { %v750_v21 = vpop.f32.mrf.mxu0 }
 0x141   : > { %v751_v24 = vadd.f32 %v750_v21, %v749_v19 }
 0x142   : > { %v752_v25 = vpop.f32.mrf.mxu0 }
 0x143   : > { %v533_v26 = vadd.f32 %v751_v24, %v712_v20 }
 0x144   : > { %v753_v27 = vpop.f32.mrf.mxu0 }
 0x145   : > { %v569_v28 = vmul.f32 0.70710677, %v533_v26  ;;  %v754_v29 = vadd.f32 %v753_v27, %v752_v25  ;;  %v562_v59 = vmul.f32 0.5, %v533_v26 }
 0x146   : > { %v755_v30 = vpop.f32.mrf.mxu0  ;;  %v761_v31 = vpop.f32.mrf.mxu1 }
 0x147   : > { %846 = verf.f32 %v569_v28  ;;  %v536_v34 = vadd.f32 %v754_v29, %v712_v20 }
 0x148   : > { %v756_v35 = vpop.f32.mrf.mxu0  ;;  %v762_v36 = vpop.f32.mrf.mxu1 }
 0x149   : > { %v570_v37 = vmul.f32 0.70710677, %v536_v34  ;;  %v757_v39 = vadd.f32 %v756_v35, %v755_v30  ;;  %v763_v40 = vadd.f32 %v762_v36, %v761_v31  ;;  %v563_v38 = vmul.f32 0.5, %v536_v34 }
 0x14a   : > { %v758_v42 = vpop.f32.mrf.mxu0  ;;  %v764_v43 = vpop.f32.mrf.mxu1 }
 0x14b   : > { %848 = verf.f32 %v570_v37  ;;  %v541_v44 = vadd.f32 %v757_v39, %v712_v20  ;;  %v549_v45 = vadd.f32 %v763_v40, %v712_v20 }
 0x14c   : > { %v759_v46 = vpop.f32.mrf.mxu0  ;;  %v765_v47 = vpop.f32.mrf.mxu1 }
 0x14d   : > { %v571_v5 = vmul.f32 0.70710677, %v541_v44  ;;  %v573_v48 = vmul.f32 0.70710677, %v549_v45  ;;  %v760_v49 = vadd.f32 %v759_v46, %v758_v42  ;;  %v766_v6 = vadd.f32 %v765_v47, %v764_v43 }
 0x14e   : > { %v767_v50 = vpop.f32.mrf.mxu1  ;;  %v564_v3 = vmul.f32 0.5, %v541_v44  ;;  %v566_v7 = vmul.f32 0.5, %v549_v45 }
 0x14f   : > { %850 = verf.f32 %v571_v5  ;;  %v544_v53 = vadd.f32 %v760_v49, %v712_v20  ;;  %v552_v11 = vadd.f32 %v766_v6, %v712_v20 }
 0x150   : > { %852 = verf.f32 %v573_v48  ;;  %v768_v54 = vpop.f32.mrf.mxu1 }
 0x151   : > { %v769_v12 = vadd.f32 %v768_v54, %v767_v50  ;;  %v572_v55 = vmul.f32 0.70710677, %v544_v53  ;;  %v574_v22 = vmul.f32 0.70710677, %v552_v11  ;;  %v565_v13 = vmul.f32 0.5, %v544_v53 }
 0x152   : > { %v770_v56 = vpop.f32.mrf.mxu1  ;;  %v567_v15 = vmul.f32 0.5, %v552_v11 }
 0x153   : > { %v557_v57 = vadd.f32 %v769_v12, %v712_v20  ;;  %854 = verf.f32 %v572_v55 }
 0x154   : > { %v847_v58 = vpop.eup %846  ;;  %v771_v23 = vpop.f32.mrf.mxu1  ;;  %856 = verf.f32 %v574_v22 }
 0x155   : > { %v583_v32 = vadd.f32 1.0, %v847_v58  ;;  %v575_v60 = vmul.f32 0.70710677, %v557_v57  ;;  %v568_v18 = vmul.f32 0.5, %v557_v57 }
 0x157   : > { %v590_v33 = vmul.f32 %v583_v32, %v562_v59  ;;  %858 = verf.f32 %v575_v60 }
 0x158   : > { %v849_v61 = vpop.eup %848 }
 0x159   : > { %597 = vst [vmem:[%s1207_s11] sm:$0xff] %v590_v33  ;;  %v584_v41 = vadd.f32 1.0, %v849_v61 }
 0x15b   : > { %v591_v62 = vmul.f32 %v584_v41, %v563_v38 }
 0x15c   : > { %v851_v1 = vpop.eup %850 }
 0x15d   : > { %v853_v2 = vpop.eup %852  ;;  %598 = vst [vmem:[%s1207_s11 + $0x8] sm:$0xff] %v591_v62  ;;  %v585_v4 = vadd.f32 1.0, %v851_v1 }
 0x15e   : > { %v587_v8 = vadd.f32 1.0, %v853_v2 }
 0x15f   : > { %v592_v9 = vmul.f32 %v585_v4, %v564_v3 }
 0x160   : > { %v594_v51 = vmul.f32 %v587_v8, %v566_v7  ;;  %v855_v10 = vpop.eup %854 }
 0x161   : > { %599 = vst [vmem:[%s1207_s11 + $0x10] sm:$0xff] %v592_v9  ;;  %v857_v52 = vpop.eup %856  ;;  %v586_v14 = vadd.f32 1.0, %v855_v10 }
 0x162   : > { %601 = vst [vmem:[%s1207_s11 + $0x20] sm:$0xff] %v594_v51  ;;  %v588_v16 = vadd.f32 1.0, %v857_v52 }
 0x163   : > { %v593_v17 = vmul.f32 %v586_v14, %v565_v13 }
 0x164   : > { %v859_v63 = vpop.eup %858  ;;  %v595_v0 = vmul.f32 %v588_v16, %v567_v15 }
 0x165   : > { %v589_v19 = vadd.f32 1.0, %v859_v63  ;;  %600 = vst [vmem:[%s1207_s11 + $0x18] sm:$0xff] %v593_v17 }
 0x166   : > { %602 = vst [vmem:[%s1207_s11 + $0x28] sm:$0xff] %v595_v0 }
 0x167   : > { %v596_v20 = vmul.f32 %v589_v19, %v568_v18 }
 0x169   : > { %603 = vst [vmem:[%s1207_s11 + $0x30] sm:$0x1] %v596_v20 }
 0x16a PF: > { %p796_p5 = scmp.ge.s32.totalorder %s920_s18, 2  ;;  %s645_s29 = sand.u32 1, %s908_s15  }
 0x16b   : > { %s646_s12 = scalar_lea.sflag [#allocation3], %s645_s29 }
 0x16c   : > { %p793_p13 = pnand %p796_p5, %p991_p6 }
 0x16e   : > { %p794_p0 = pneg %p793_p13 }
 0x170   : > { %903 = dma.done.wait (%p794_p0), %s646_s12, 16  }
 0x171   : > { %905 = vsyncadd (%p794_p0), %s646_s12, 4294967280  ;;  %p15_p1 = scmp.ge.s32.totalorder %s974_s21, 4   ;;  %s1240_s15 = smov %s912_s16 }
 0x172   : > { %s1241_s16 = smov %s916_s17  ;;  %s1242_s17 = smov %s985_s24 }
 0x173   : > { %s1243_s18 = smov %s974_s21  ;;  %17 = sbr.rel (!%p15_p1) target bundleno = 3 (0x3), region = 79 }
 0x178   :  { %650 = vsyncpa [#allocation3], 1 }
 0x179   :  { %652 = vsyncpa [#allocation3 + $0x1], 1 }

</bundles_post_ra>
